<compile_context>
chip_gen: v6e
topology: v6e:2x2x1
jax: 0.10.0
libtpu: 0.0.40
codegen_flags: <defaults>
</compile_context>

<pallas_src>
import jax
import jax.numpy as jnp
import numpy as np
from jax.experimental import pallas as pl
from jax.experimental.pallas import tpu as pltpu

NEG = -1e30  # effective -inf for maxpool padding (finite, f32-representable)


# --------------------------- host-side constant packing ---------------------------

def _pack_sepconv(w_dw, w_pw, scale, W):
    """Fuse depthwise 3x3 + pointwise 1x1 + BN scale into 3 banded matrices.

    w_dw: (3, 3, Ci) depthwise weights [kh, kw, c]
    w_pw: (Ci, Co)   pointwise weights [c, o]
    scale: (Co,)     folded BN scale
    Returns (3, W*Ci, W*Co):  out[:, h, :] = sum_dh  in_pad[:, h+dh, :] @ M[dh]
    (lane packing: input lane = w*Ci + c, output lane = w*Co + o; W boundaries are
    handled by the band structure, i.e. out-of-range taps simply have zero columns).
    """
    Ci, Co = w_pw.shape
    pws = (w_pw * scale[None, :]).astype(jnp.float32)
    idx = jnp.arange(W)
    # band[dw, w_in, w_out] = 1  iff  w_in == w_out + dw - 1
    band = (idx[None, :, None] == (idx[None, None, :] + jnp.arange(3)[:, None, None] - 1))
    band = band.astype(jnp.float32)                                    # (3, W, W)
    m = jnp.einsum('dwv,hdc,co->hwcvo', band, w_dw.astype(jnp.float32), pws)
    return m.reshape(3, W * Ci, W * Co)


def _pack_residual(w_res, scale, W, Wo):
    """1x1 stride-2 conv weight (+BN scale, + stride-2 W decimation) -> (W*Ci, Wo*Co)."""
    Ci, Co = w_res.shape
    ws = (w_res * scale[None, :]).astype(jnp.float32)
    sel = (jnp.arange(W)[:, None] == 2 * jnp.arange(Wo)[None, :]).astype(jnp.float32)
    return (sel[:, None, :, None] * ws[None, :, None, :]).reshape(W * Ci, Wo * Co)


def _pack_decimation(W, Wo, C):
    """0/1 selection matrix (W*C, Wo*C) taking every other w position (stride 2)."""
    sel = (jnp.arange(W)[:, None] == 2 * jnp.arange(Wo)[None, :]).astype(jnp.float32)
    eye = jnp.eye(C, dtype=jnp.float32)
    return (sel[:, None, :, None] * eye[None, :, None, :]).reshape(W * C, Wo * C)


# --------------------------------- the kernel -------------------------------------

def _make_kernel(c_out):
    def kernel(xp_ref, m1_ref, t1_ref, m2_ref, wres_ref, sel_ref, tout_ref,
               out_ref, pad_ref):
        BT, Hp, WCi = xp_ref.shape
        H = Hp - 2
        _, Ho, WoCo = out_ref.shape
        WCo = pad_ref.shape[-1]

        def sepconv(src_ref, m_ref):
            # three banded MXU matmuls (one per kernel row), f32 accumulation
            acc = None
            for dh in range(3):
                rows = src_ref[:, pl.ds(dh, H), :].reshape(BT * H, src_ref.shape[-1])
                part = jnp.dot(rows, m_ref[dh], preferred_element_type=jnp.float32)
                acc = part if acc is None else acc + part
            return acc.reshape(BT, H, m_ref.shape[-1])

        # ---- SeparableConv1 (+BN1 scale folded) -> +BN1 shift -> ReLU ----
        # (input already H-padded host-side, so no staging store needed)
        y1 = jnp.maximum(sepconv(xp_ref, m1_ref) + t1_ref[...], 0.0)

        # ---- SeparableConv2 (+BN2 scale folded); BN2 shift deferred past the maxpool ----
        zrow = jnp.zeros((BT, 1, WCo), jnp.float32)
        pad_ref[:, pl.ds(0, 1), :] = zrow                 # thin border rows only
        pad_ref[:, pl.ds(H + 1, 1), :] = zrow
        pad_ref[:, pl.ds(1, H), :] = y1
        y2 = sepconv(pad_ref, m2_ref)

        # ---- MaxPool2d(kernel=3, stride=2, padding=1) ----
        # (a) 3-wide max along W at full width: lane rolls of +/-Cout, boundaries -> -inf
        lane = jax.lax.broadcasted_iota(jnp.int32, (BT, H, WCo), 2)
        left = jnp.where(lane < c_out, NEG, pltpu.roll(y2, c_out, 2))          # reads w-1
        right = jnp.where(lane >= WCo - c_out, NEG, pltpu.roll(y2, WCo - c_out, 2))  # reads w+1
        m_w = jnp.maximum(y2, jnp.maximum(left, right))
        # (b) 3-tall max along H with stride 2, via the (-inf)-row-padded shared scratch
        nrow = jnp.full((BT, 1, WCo), NEG, jnp.float32)
        pad_ref[:, pl.ds(0, 1), :] = nrow
        pad_ref[:, pl.ds(H + 1, 1), :] = nrow
        pad_ref[:, pl.ds(1, H), :] = m_w
        m_h = jnp.maximum(
            jnp.maximum(pad_ref[:, pl.ds(0, Ho, stride=2), :],
                        pad_ref[:, pl.ds(1, Ho, stride=2), :]),
            pad_ref[:, pl.ds(2, Ho, stride=2), :])
        # (c) single stride-2 W decimation via a 0/1 selection matmul (MXU, off the VPU path)
        mp = jnp.dot(m_h.reshape(BT * Ho, WCo), sel_ref[...],
                     preferred_element_type=jnp.float32)

        # ---- residual branch: 1x1 conv stride 2 (H by strided read, W folded into weight) ----
        xd = xp_ref[:, pl.ds(1, Ho, stride=2), :].reshape(BT * Ho, WCi)
        res = jnp.dot(xd, wres_ref[...], preferred_element_type=jnp.float32)

        # bn2_shift + bnr_shift are per-channel constants -> applied once after the pool
        out = (mp + res).reshape(BT, Ho, WoCo) + tout_ref[...]
        out_ref[...] = out.astype(out_ref.dtype)

    return kernel


# ----------------------------------- wrapper --------------------------------------

def residual_block_forward(x_nchw, params, *, batch_tile=1):
    B, Cin, H, W = x_nchw.shape
    Cout = params["w_pw1"].shape[1]
    Ho = (H - 1) // 2 + 1
    Wo = (W - 1) // 2 + 1
    BT = batch_tile
    assert B % BT == 0, "batch_tile must divide batch"

    # NCHW -> lane-packed (B, H, W*Cin), H-padded by one zero row top/bottom
    x = jnp.transpose(x_nchw, (0, 2, 3, 1)).astype(jnp.float32).reshape(B, H, W * Cin)
    x_p = jnp.pad(x, ((0, 0), (1, 1), (0, 0)))

    # host-side constants (BN scales folded into weights; shifts tiled over lanes)
    m1 = _pack_sepconv(params["w_dw1"], params["w_pw1"], params["bn1_scale"], W)
    m2 = _pack_sepconv(params["w_dw2"], params["w_pw2"], params["bn2_scale"], W)
    wres = _pack_residual(params["w_res"], params["bnr_scale"], W, Wo)
    sel = _pack_decimation(W, Wo, Cout)
    t1 = jnp.tile(params["bn1_shift"].astype(jnp.float32), W).reshape(1, W * Cout)
    tout = jnp.tile((params["bn2_shift"] + params["bnr_shift"]).astype(jnp.float32),
                    Wo).reshape(1, Wo * Cout)

    def const_spec(shape):
        nd = len(shape)
        return pl.BlockSpec(shape, lambda b, _nd=nd: (0,) * _nd)

    out = pl.pallas_call(
        _make_kernel(Cout),
        out_shape=jax.ShapeDtypeStruct((B, Ho, Wo * Cout), jnp.float32),
        grid=(B // BT,),
        in_specs=[
            pl.BlockSpec((BT, H + 2, W * Cin), lambda b: (b, 0, 0)),
            const_spec(m1.shape), const_spec(t1.shape), const_spec(m2.shape),
            const_spec(wres.shape), const_spec(sel.shape), const_spec(tout.shape),
        ],
        out_specs=pl.BlockSpec((BT, Ho, Wo * Cout), lambda b: (b, 0, 0)),
        scratch_shapes=[
            # single shared staging buffer: conv2 input (zero rows) then maxpool input (-inf rows)
            pltpu.VMEM((BT, H + 2, W * Cout), jnp.float32),
        ],
        # grid >= 2 "parallel" steps -> sharded across v7x's two TensorCores; raise
        # vmem_limit_bytes here only if tiles are scaled up well beyond these toy shapes.
        compiler_params=pltpu.CompilerParams(dimension_semantics=("parallel",)),
    )(x_p, m1, t1, m2, wres, sel, tout)

    return jnp.transpose(out.reshape(B, Ho, Wo, Cout), (0, 3, 1, 2))   # -> NCHW


# --------------------------- pure-JAX reference check ------------------------------

def ref_forward(x_nchw, p):
    dn = ("NHWC", "HWIO", "NHWC")
    prec = jax.lax.Precision.HIGHEST
    x = jnp.transpose(x_nchw, (0, 2, 3, 1)).astype(jnp.float32)
    Cin = x.shape[-1]

    y = jax.lax.conv_general_dilated(x, p["w_dw1"][:, :, None, :], (1, 1),
                                     ((1, 1), (1, 1)), dimension_numbers=dn,
                                     feature_group_count=Cin, precision=prec)
    y = jax.lax.conv_general_dilated(y, p["w_pw1"][None, None, :, :], (1, 1), "VALID",
                                     dimension_numbers=dn, precision=prec)
    y = jnp.maximum(y * p["bn1_scale"] + p["bn1_shift"], 0.0)
    Cmid = y.shape[-1]
    y = jax.lax.conv_general_dilated(y, p["w_dw2"][:, :, None, :], (1, 1),
                                     ((1, 1), (1, 1)), dimension_numbers=dn,
                                     feature_group_count=Cmid, precision=prec)
    y = jax.lax.conv_general_dilated(y, p["w_pw2"][None, None, :, :], (1, 1), "VALID",
                                     dimension_numbers=dn, precision=prec)
    y = y * p["bn2_scale"] + p["bn2_shift"]
    y = jax.lax.reduce_window(y, -jnp.inf, jax.lax.max, (1, 3, 3, 1), (1, 2, 2, 1),
                              ((0, 0), (1, 1), (1, 1), (0, 0)))
    r = jax.lax.conv_general_dilated(x, p["w_res"][None, None, :, :], (2, 2), "VALID",
                                     dimension_numbers=dn, precision=prec)
    r = r * p["bnr_scale"] + p["bnr_shift"]
    return jnp.transpose(r + y, (0, 3, 1, 2))


# ------------------------------------- main ----------------------------------------

def _bn_fold(k, c, eps=1e-3):
    k1, k2, k3, k4 = jax.random.split(k, 4)
    gamma = 1.0 + 0.1 * jax.random.normal(k1, (c,), jnp.float32)
    beta = 0.1 * jax.random.normal(k2, (c,), jnp.float32)
    mean = 0.1 * jax.random.normal(k3, (c,), jnp.float32)
    var = 0.5 + 0.5 * jnp.abs(jax.random.normal(k4, (c,), jnp.float32))
    scale = gamma / jnp.sqrt(var + eps)
    shift = beta - mean * scale
    return scale, shift


if __name__ == "__main__":
    B, Cin, Cout, H, W = 2, 4, 8, 16, 16

    key = jax.random.PRNGKey(0)
    ks = jax.random.split(key, 9)

    def w(k, shape, scale=0.3):
        return scale * jax.random.normal(k, shape, jnp.float32)

    s1, t1 = _bn_fold(ks[5], Cout)
    s2, t2 = _bn_fold(ks[6], Cout)
    sr, tr = _bn_fold(ks[7], Cout)

    params = {
        "w_dw1": w(ks[0], (3, 3, Cin)),        # torch depthwise weight[c,0,kh,kw] -> [kh,kw,c]
        "w_pw1": w(ks[1], (Cin, Cout)),        # torch pointwise weight[o,c,0,0]   -> [c,o]
        "w_dw2": w(ks[2], (3, 3, Cout)),
        "w_pw2": w(ks[3], (Cout, Cout)),
        "w_res": w(ks[4], (Cin, Cout)),        # residual 1x1 conv weight          -> [c,o]
        "bn1_scale": s1, "bn1_shift": t1,
        "bn2_scale": s2, "bn2_shift": t2,
        "bnr_scale": sr, "bnr_shift": tr,
    }

    x = jax.random.normal(ks[8], (B, Cin, H, W), jnp.float32)          # NCHW like PyTorch

    out = jax.block_until_ready(residual_block_forward(x, params))
    ref = jax.block_until_ready(ref_forward(x, params))

    assert out.shape == (B, Cout, 8, 8), out.shape
    # All operands are f32 now (bf16 casts removed); remaining tolerance only covers MXU
    # accumulation-order / pass-structure differences vs the HIGHEST-precision lax reference.
    np.testing.assert_allclose(np.asarray(out), np.asarray(ref), atol=1e-2, rtol=1e-2)
    print("KERNEL_OK")
</pallas_src>

<mosaic_0001>
module attributes {stable_mosaic.version = 11 : i64} {
  func.func @kernel(%arg0: i32, %arg1: memref<1x18x64xf32, #tpu.memory_space<vmem>>, %arg2: memref<3x64x128xf32, #tpu.memory_space<vmem>>, %arg3: memref<1x128xf32, #tpu.memory_space<vmem>>, %arg4: memref<3x128x128xf32, #tpu.memory_space<vmem>>, %arg5: memref<64x64xf32, #tpu.memory_space<vmem>>, %arg6: memref<128x64xf32, #tpu.memory_space<vmem>>, %arg7: memref<1x64xf32, #tpu.memory_space<vmem>>, %arg8: memref<1x8x64xf32, #tpu.memory_space<vmem>>, %arg9: memref<1x18x128xf32, #tpu.memory_space<vmem>>) attributes {dimension_semantics = [#tpu.dimension_semantics<parallel>], iteration_bounds = array<i64: 2>, scalar_prefetch = 0 : i64, scratch_operands = 1 : i64, tpu.core_type = #tpu.core_type<tc>, window_params = [{transform_indices = @transform_0, window_bounds = array<i64: 1, 18, 64>}, {pipeline_mode = #tpu.pipeline_mode<synchronous>, transform_indices = @transform_1, window_bounds = array<i64: 3, 64, 128>}, {pipeline_mode = #tpu.pipeline_mode<synchronous>, transform_indices = @transform_2, window_bounds = array<i64: 1, 128>}, {pipeline_mode = #tpu.pipeline_mode<synchronous>, transform_indices = @transform_3, window_bounds = array<i64: 3, 128, 128>}, {pipeline_mode = #tpu.pipeline_mode<synchronous>, transform_indices = @transform_4, window_bounds = array<i64: 64, 64>}, {pipeline_mode = #tpu.pipeline_mode<synchronous>, transform_indices = @transform_5, window_bounds = array<i64: 128, 64>}, {pipeline_mode = #tpu.pipeline_mode<synchronous>, transform_indices = @transform_6, window_bounds = array<i64: 1, 64>}, {transform_indices = @transform_7, window_bounds = array<i64: 1, 8, 64>}]} {
    %c0 = arith.constant 0 : index
    %c0_0 = arith.constant 0 : index
    %c0_1 = arith.constant 0 : index
    %0 = vector.load %arg1[%c0, %c0_0, %c0_1] : memref<1x18x64xf32, #tpu.memory_space<vmem>>, vector<1x16x64xf32>
    %1 = vector.shape_cast %0 : vector<1x16x64xf32> to vector<16x64xf32>
    %c0_2 = arith.constant 0 : index
    %c0_3 = arith.constant 0 : index
    %c0_4 = arith.constant 0 : index
    %2 = vector.load %arg2[%c0_2, %c0_3, %c0_4] : memref<3x64x128xf32, #tpu.memory_space<vmem>>, vector<1x64x128xf32>
    %3 = vector.shape_cast %2 : vector<1x64x128xf32> to vector<64x128xf32>
    %cst = arith.constant dense<0.000000e+00> : vector<16x128xf32>
    %4 = tpu.matmul %1, %3, %cst {dimension_numbers = #tpu.dot_dimension_numbers<[1], [0], [0], [1], [0, 0, 1, 1], [], []>} : vector<16x64xf32>, vector<64x128xf32>, vector<16x128xf32> -> vector<16x128xf32>
    %c0_5 = arith.constant 0 : index
    %c1 = arith.constant 1 : index
    %c0_6 = arith.constant 0 : index
    %5 = vector.load %arg1[%c0_5, %c1, %c0_6] : memref<1x18x64xf32, #tpu.memory_space<vmem>>, vector<1x16x64xf32>
    %6 = vector.shape_cast %5 : vector<1x16x64xf32> to vector<16x64xf32>
    %c1_7 = arith.constant 1 : index
    %c0_8 = arith.constant 0 : index
    %c0_9 = arith.constant 0 : index
    %7 = vector.load %arg2[%c1_7, %c0_8, %c0_9] : memref<3x64x128xf32, #tpu.memory_space<vmem>>, vector<1x64x128xf32>
    %8 = vector.shape_cast %7 : vector<1x64x128xf32> to vector<64x128xf32>
    %cst_10 = arith.constant dense<0.000000e+00> : vector<16x128xf32>
    %9 = tpu.matmul %6, %8, %cst_10 {dimension_numbers = #tpu.dot_dimension_numbers<[1], [0], [0], [1], [0, 0, 1, 1], [], []>} : vector<16x64xf32>, vector<64x128xf32>, vector<16x128xf32> -> vector<16x128xf32>
    %10 = arith.addf %4, %9 : vector<16x128xf32>
    %c0_11 = arith.constant 0 : index
    %c2 = arith.constant 2 : index
    %c0_12 = arith.constant 0 : index
    %11 = vector.load %arg1[%c0_11, %c2, %c0_12] : memref<1x18x64xf32, #tpu.memory_space<vmem>>, vector<1x16x64xf32>
    %12 = vector.shape_cast %11 : vector<1x16x64xf32> to vector<16x64xf32>
    %c2_13 = arith.constant 2 : index
    %c0_14 = arith.constant 0 : index
    %c0_15 = arith.constant 0 : index
    %13 = vector.load %arg2[%c2_13, %c0_14, %c0_15] : memref<3x64x128xf32, #tpu.memory_space<vmem>>, vector<1x64x128xf32>
    %14 = vector.shape_cast %13 : vector<1x64x128xf32> to vector<64x128xf32>
    %cst_16 = arith.constant dense<0.000000e+00> : vector<16x128xf32>
    %15 = tpu.matmul %12, %14, %cst_16 {dimension_numbers = #tpu.dot_dimension_numbers<[1], [0], [0], [1], [0, 0, 1, 1], [], []>} : vector<16x64xf32>, vector<64x128xf32>, vector<16x128xf32> -> vector<16x128xf32>
    %16 = arith.addf %10, %15 : vector<16x128xf32>
    %17 = vector.shape_cast %16 : vector<16x128xf32> to vector<1x16x128xf32>
    %c0_17 = arith.constant 0 : index
    %c0_18 = arith.constant 0 : index
    %18 = vector.load %arg3[%c0_17, %c0_18] : memref<1x128xf32, #tpu.memory_space<vmem>>, vector<1x128xf32>
    %19 = vector.shape_cast %18 : vector<1x128xf32> to vector<1x1x128xf32>
    %20 = vector.broadcast %19 : vector<1x1x128xf32> to vector<1x16x128xf32>
    %21 = arith.addf %17, %20 : vector<1x16x128xf32>
    %cst_19 = arith.constant 0.000000e+00 : f32
    %22 = vector.broadcast %cst_19 : f32 to vector<1x16x128xf32>
    %23 = arith.maximumf %21, %22 : vector<1x16x128xf32>
    %cst_20 = arith.constant 0.000000e+00 : f32
    %24 = vector.broadcast %cst_20 : f32 to vector<1x1x128xf32>
    %c0_21 = arith.constant 0 : index
    %c0_22 = arith.constant 0 : index
    %c0_23 = arith.constant 0 : index
    %25 = vector.load %arg9[%c0_21, %c0_22, %c0_23] : memref<1x18x128xf32, #tpu.memory_space<vmem>>, vector<1x1x128xf32>
    tpu.vector_store %arg9[%c0_21, %c0_22, %c0_23], %24 {strides = array<i32>} : memref<1x18x128xf32, #tpu.memory_space<vmem>>, vector<1x1x128xf32>,
    %c0_24 = arith.constant 0 : index
    %c17 = arith.constant 17 : index
    %c0_25 = arith.constant 0 : index
    %26 = vector.load %arg9[%c0_24, %c17, %c0_25] : memref<1x18x128xf32, #tpu.memory_space<vmem>>, vector<1x1x128xf32>
    tpu.vector_store %arg9[%c0_24, %c17, %c0_25], %24 {strides = array<i32>} : memref<1x18x128xf32, #tpu.memory_space<vmem>>, vector<1x1x128xf32>,
    %c0_26 = arith.constant 0 : index
    %c1_27 = arith.constant 1 : index
    %c0_28 = arith.constant 0 : index
    %27 = vector.load %arg9[%c0_26, %c1_27, %c0_28] : memref<1x18x128xf32, #tpu.memory_space<vmem>>, vector<1x16x128xf32>
    tpu.vector_store %arg9[%c0_26, %c1_27, %c0_28], %23 {strides = array<i32>} : memref<1x18x128xf32, #tpu.memory_space<vmem>>, vector<1x16x128xf32>,
    %c0_29 = arith.constant 0 : index
    %c0_30 = arith.constant 0 : index
    %c0_31 = arith.constant 0 : index
    %28 = vector.load %arg9[%c0_29, %c0_30, %c0_31] : memref<1x18x128xf32, #tpu.memory_space<vmem>>, vector<1x16x128xf32>
    %29 = vector.shape_cast %28 : vector<1x16x128xf32> to vector<16x128xf32>
    %c0_32 = arith.constant 0 : index
    %c0_33 = arith.constant 0 : index
    %c0_34 = arith.constant 0 : index
    %30 = vector.load %arg4[%c0_32, %c0_33, %c0_34] : memref<3x128x128xf32, #tpu.memory_space<vmem>>, vector<1x128x128xf32>
    %31 = vector.shape_cast %30 : vector<1x128x128xf32> to vector<128x128xf32>
    %cst_35 = arith.constant dense<0.000000e+00> : vector<16x128xf32>
    %32 = tpu.matmul %29, %31, %cst_35 {dimension_numbers = #tpu.dot_dimension_numbers<[1], [0], [0], [1], [0, 0, 1, 1], [], []>} : vector<16x128xf32>, vector<128x128xf32>, vector<16x128xf32> -> vector<16x128xf32>
    %c0_36 = arith.constant 0 : index
    %c1_37 = arith.constant 1 : index
    %c0_38 = arith.constant 0 : index
    %33 = vector.load %arg9[%c0_36, %c1_37, %c0_38] : memref<1x18x128xf32, #tpu.memory_space<vmem>>, vector<1x16x128xf32>
    %34 = vector.shape_cast %33 : vector<1x16x128xf32> to vector<16x128xf32>
    %c1_39 = arith.constant 1 : index
    %c0_40 = arith.constant 0 : index
    %c0_41 = arith.constant 0 : index
    %35 = vector.load %arg4[%c1_39, %c0_40, %c0_41] : memref<3x128x128xf32, #tpu.memory_space<vmem>>, vector<1x128x128xf32>
    %36 = vector.shape_cast %35 : vector<1x128x128xf32> to vector<128x128xf32>
    %cst_42 = arith.constant dense<0.000000e+00> : vector<16x128xf32>
    %37 = tpu.matmul %34, %36, %cst_42 {dimension_numbers = #tpu.dot_dimension_numbers<[1], [0], [0], [1], [0, 0, 1, 1], [], []>} : vector<16x128xf32>, vector<128x128xf32>, vector<16x128xf32> -> vector<16x128xf32>
    %38 = arith.addf %32, %37 : vector<16x128xf32>
    %c0_43 = arith.constant 0 : index
    %c2_44 = arith.constant 2 : index
    %c0_45 = arith.constant 0 : index
    %39 = vector.load %arg9[%c0_43, %c2_44, %c0_45] : memref<1x18x128xf32, #tpu.memory_space<vmem>>, vector<1x16x128xf32>
    %40 = vector.shape_cast %39 : vector<1x16x128xf32> to vector<16x128xf32>
    %c2_46 = arith.constant 2 : index
    %c0_47 = arith.constant 0 : index
    %c0_48 = arith.constant 0 : index
    %41 = vector.load %arg4[%c2_46, %c0_47, %c0_48] : memref<3x128x128xf32, #tpu.memory_space<vmem>>, vector<1x128x128xf32>
    %42 = vector.shape_cast %41 : vector<1x128x128xf32> to vector<128x128xf32>
    %cst_49 = arith.constant dense<0.000000e+00> : vector<16x128xf32>
    %43 = tpu.matmul %40, %42, %cst_49 {dimension_numbers = #tpu.dot_dimension_numbers<[1], [0], [0], [1], [0, 0, 1, 1], [], []>} : vector<16x128xf32>, vector<128x128xf32>, vector<16x128xf32> -> vector<16x128xf32>
    %44 = arith.addf %38, %43 : vector<16x128xf32>
    %45 = vector.shape_cast %44 : vector<16x128xf32> to vector<1x16x128xf32>
    %46 = tpu.iota {dimensions = array<i32: 2>} : vector<1x16x128xi32>
    %c8_i32 = arith.constant 8 : i32
    %47 = vector.broadcast %c8_i32 : i32 to vector<1x16x128xi32>
    %48 = arith.cmpi slt, %46, %47 : vector<1x16x128xi32>
    %c8_i32_50 = arith.constant 8 : i32
    %49 = tpu.dynamic_rotate %45 by %c8_i32_50 dim 2 : vector<1x16x128xf32>, i32 -> vector<1x16x128xf32>
    %cst_51 = arith.constant -1.000000e+30 : f32
    %50 = vector.broadcast %cst_51 : f32 to vector<1x16x128xf32>
    %51 = arith.select %48, %50, %49 : vector<1x16x128xi1>, vector<1x16x128xf32>
    %c120_i32 = arith.constant 120 : i32
    %52 = vector.broadcast %c120_i32 : i32 to vector<1x16x128xi32>
    %53 = arith.cmpi sge, %46, %52 : vector<1x16x128xi32>
    %c120_i32_52 = arith.constant 120 : i32
    %54 = tpu.dynamic_rotate %45 by %c120_i32_52 dim 2 : vector<1x16x128xf32>, i32 -> vector<1x16x128xf32>
    %cst_53 = arith.constant -1.000000e+30 : f32
    %55 = vector.broadcast %cst_53 : f32 to vector<1x16x128xf32>
    %56 = arith.select %53, %55, %54 : vector<1x16x128xi1>, vector<1x16x128xf32>
    %57 = arith.maximumf %51, %56 : vector<1x16x128xf32>
    %58 = arith.maximumf %45, %57 : vector<1x16x128xf32>
    %cst_54 = arith.constant -1.000000e+30 : f32
    %59 = vector.broadcast %cst_54 : f32 to vector<1x1x128xf32>
    %c0_55 = arith.constant 0 : index
    %c0_56 = arith.constant 0 : index
    %c0_57 = arith.constant 0 : index
    %60 = vector.load %arg9[%c0_55, %c0_56, %c0_57] : memref<1x18x128xf32, #tpu.memory_space<vmem>>, vector<1x1x128xf32>
    tpu.vector_store %arg9[%c0_55, %c0_56, %c0_57], %59 {strides = array<i32>} : memref<1x18x128xf32, #tpu.memory_space<vmem>>, vector<1x1x128xf32>,
    %c0_58 = arith.constant 0 : index
    %c17_59 = arith.constant 17 : index
    %c0_60 = arith.constant 0 : index
    %61 = vector.load %arg9[%c0_58, %c17_59, %c0_60] : memref<1x18x128xf32, #tpu.memory_space<vmem>>, vector<1x1x128xf32>
    tpu.vector_store %arg9[%c0_58, %c17_59, %c0_60], %59 {strides = array<i32>} : memref<1x18x128xf32, #tpu.memory_space<vmem>>, vector<1x1x128xf32>,
    %c0_61 = arith.constant 0 : index
    %c1_62 = arith.constant 1 : index
    %c0_63 = arith.constant 0 : index
    %62 = vector.load %arg9[%c0_61, %c1_62, %c0_63] : memref<1x18x128xf32, #tpu.memory_space<vmem>>, vector<1x16x128xf32>
    tpu.vector_store %arg9[%c0_61, %c1_62, %c0_63], %58 {strides = array<i32>} : memref<1x18x128xf32, #tpu.memory_space<vmem>>, vector<1x16x128xf32>,
    %c0_64 = arith.constant 0 : index
    %c0_65 = arith.constant 0 : index
    %c0_66 = arith.constant 0 : index
    %63 = tpu.strided_load %arg9[%c0_64, %c0_65, %c0_66] {strides = array<i32: 1, 2, 1>} : memref<1x18x128xf32, #tpu.memory_space<vmem>>, vector<1x8x128xf32>
    %c0_67 = arith.constant 0 : index
    %c1_68 = arith.constant 1 : index
    %c0_69 = arith.constant 0 : index
    %64 = tpu.strided_load %arg9[%c0_67, %c1_68, %c0_69] {strides = array<i32: 1, 2, 1>} : memref<1x18x128xf32, #tpu.memory_space<vmem>>, vector<1x8x128xf32>
    %65 = arith.maximumf %63, %64 : vector<1x8x128xf32>
    %c0_70 = arith.constant 0 : index
    %c2_71 = arith.constant 2 : index
    %c0_72 = arith.constant 0 : index
    %66 = tpu.strided_load %arg9[%c0_70, %c2_71, %c0_72] {strides = array<i32: 1, 2, 1>} : memref<1x18x128xf32, #tpu.memory_space<vmem>>, vector<1x8x128xf32>
    %67 = arith.maximumf %65, %66 : vector<1x8x128xf32>
    %68 = vector.shape_cast %67 : vector<1x8x128xf32> to vector<8x128xf32>
    %c0_73 = arith.constant 0 : index
    %c0_74 = arith.constant 0 : index
    %69 = vector.load %arg6[%c0_73, %c0_74] : memref<128x64xf32, #tpu.memory_space<vmem>>, vector<128x64xf32>
    %cst_75 = arith.constant dense<0.000000e+00> : vector<8x64xf32>
    %70 = tpu.matmul %68, %69, %cst_75 {dimension_numbers = #tpu.dot_dimension_numbers<[1], [0], [0], [1], [0, 0, 1, 1], [], []>} : vector<8x128xf32>, vector<128x64xf32>, vector<8x64xf32> -> vector<8x64xf32>
    %c0_76 = arith.constant 0 : index
    %c1_77 = arith.constant 1 : index
    %c0_78 = arith.constant 0 : index
    %71 = tpu.strided_load %arg1[%c0_76, %c1_77, %c0_78] {strides = array<i32: 1, 2, 1>} : memref<1x18x64xf32, #tpu.memory_space<vmem>>, vector<1x8x64xf32>
    %72 = vector.shape_cast %71 : vector<1x8x64xf32> to vector<8x64xf32>
    %c0_79 = arith.constant 0 : index
    %c0_80 = arith.constant 0 : index
    %73 = vector.load %arg5[%c0_79, %c0_80] : memref<64x64xf32, #tpu.memory_space<vmem>>, vector<64x64xf32>
    %cst_81 = arith.constant dense<0.000000e+00> : vector<8x64xf32>
    %74 = tpu.matmul %72, %73, %cst_81 {dimension_numbers = #tpu.dot_dimension_numbers<[1], [0], [0], [1], [0, 0, 1, 1], [], []>} : vector<8x64xf32>, vector<64x64xf32>, vector<8x64xf32> -> vector<8x64xf32>
    %75 = arith.addf %70, %74 : vector<8x64xf32>
    %76 = vector.shape_cast %75 : vector<8x64xf32> to vector<1x8x64xf32>
    %c0_82 = arith.constant 0 : index
    %c0_83 = arith.constant 0 : index
    %77 = vector.load %arg7[%c0_82, %c0_83] : memref<1x64xf32, #tpu.memory_space<vmem>>, vector<1x64xf32>
    %78 = vector.shape_cast %77 : vector<1x64xf32> to vector<1x1x64xf32>
    %79 = vector.broadcast %78 : vector<1x1x64xf32> to vector<1x8x64xf32>
    %80 = arith.addf %76, %79 : vector<1x8x64xf32>
    %c0_84 = arith.constant 0 : index
    %c0_85 = arith.constant 0 : index
    %c0_86 = arith.constant 0 : index
    %81 = vector.load %arg8[%c0_84, %c0_85, %c0_86] : memref<1x8x64xf32, #tpu.memory_space<vmem>>, vector<1x8x64xf32>
    tpu.vector_store %arg8[%c0_84, %c0_85, %c0_86], %80 {strides = array<i32>} : memref<1x8x64xf32, #tpu.memory_space<vmem>>, vector<1x8x64xf32>,
    return
  }
  func.func @transform_0(%arg0: i32) -> (i32, i32, i32) {
    %c0_i32 = arith.constant 0 : i32
    %c0_i32_0 = arith.constant 0 : i32
    %c0_i32_1 = arith.constant 0 : i32
    return %arg0, %c0_i32, %c0_i32_0 : i32, i32, i32
  }
  func.func @transform_1(%arg0: i32) -> (i32, i32, i32) {
    %c0_i32 = arith.constant 0 : i32
    %c0_i32_0 = arith.constant 0 : i32
    %c0_i32_1 = arith.constant 0 : i32
    %c0_i32_2 = arith.constant 0 : i32
    return %c0_i32, %c0_i32_0, %c0_i32_1 : i32, i32, i32
  }
  func.func @transform_2(%arg0: i32) -> (i32, i32) {
    %c0_i32 = arith.constant 0 : i32
    %c0_i32_0 = arith.constant 0 : i32
    %c0_i32_1 = arith.constant 0 : i32
    return %c0_i32, %c0_i32_0 : i32, i32
  }
  func.func @transform_3(%arg0: i32) -> (i32, i32, i32) {
    %c0_i32 = arith.constant 0 : i32
    %c0_i32_0 = arith.constant 0 : i32
    %c0_i32_1 = arith.constant 0 : i32
    %c0_i32_2 = arith.constant 0 : i32
    return %c0_i32, %c0_i32_0, %c0_i32_1 : i32, i32, i32
  }
  func.func @transform_4(%arg0: i32) -> (i32, i32) {
    %c0_i32 = arith.constant 0 : i32
    %c0_i32_0 = arith.constant 0 : i32
    %c0_i32_1 = arith.constant 0 : i32
    return %c0_i32, %c0_i32_0 : i32, i32
  }
  func.func @transform_5(%arg0: i32) -> (i32, i32) {
    %c0_i32 = arith.constant 0 : i32
    %c0_i32_0 = arith.constant 0 : i32
    %c0_i32_1 = arith.constant 0 : i32
    return %c0_i32, %c0_i32_0 : i32, i32
  }
  func.func @transform_6(%arg0: i32) -> (i32, i32) {
    %c0_i32 = arith.constant 0 : i32
    %c0_i32_0 = arith.constant 0 : i32
    %c0_i32_1 = arith.constant 0 : i32
    return %c0_i32, %c0_i32_0 : i32, i32
  }
  func.func @transform_7(%arg0: i32) -> (i32, i32, i32) {
    %c0_i32 = arith.constant 0 : i32
    %c0_i32_0 = arith.constant 0 : i32
    %c0_i32_1 = arith.constant 0 : i32
    return %arg0, %c0_i32, %c0_i32_0 : i32, i32, i32
  }
}

</mosaic_0001>

<bundles_post_ra>
// kernel: tpu_custom_call.1
= control target key start
LH: loop header
LB: loop body
LE: loop exit
PB: predicated region body
PF: predicated region fallthrough
CT: control target
= control target key end

     0   :  { %12 = vsyncpa [#allocation4], 0  ;;  %s2094_s0 = inlined_call_operand.vmem [shape: f32[2,18,64], index: 0, kind: input, shape index: {}]   ;;  %s2095_s1 = inlined_call_operand.vmem [shape: f32[3,64,128], index: 1, kind: input, shape index: {}]   ;;  %s2096_s2 = inlined_call_operand.vmem [shape: f32[1,128], index: 2, kind: input, shape index: {}]   ;;  %s2097_s3 = inlined_call_operand.hbm [shape: f32[3,128,128], index: 3, kind: input, shape index: {}]   ;;  %s2098_s4 = inlined_call_operand.hbm [shape: f32[64,64], index: 4, kind: input, shape index: {}]   ;;  %s2099_s5 = inlined_call_operand.vmem [shape: f32[128,64], index: 5, kind: input, shape index: {}]   ;;  %s2100_s6 = inlined_call_operand.vmem [shape: f32[1,64], index: 6, kind: input, shape index: {}]   ;;  %s2101_s7 = inlined_call_operand.hbm [shape: f32[2,8,64], index: 7, kind: output, shape index: {}]  }
   0x1   :  { %13 = vsyncpa [#allocation7], 0 }
   0x2   :  { %14 = vsyncpa [#allocation5], 0 }
   0x3   :  { %16 = vsyncpa [#allocation5 + $0x1], 0  ;;  %s1793_s24 = smov 0   ;;  %s1795_s25 = smov 0  }
   0x4   :  { %s1797_s26 = smov 0   ;;  %s1799_s27 = smov 0  }
   0x5 LB: > { %s1814_s28 = sadd.s32 4294967295, %s1741_s27   ;;  %s1187_s29 = sadd.s32 4294967294, %s1741_s27   ;;  %s1741_s27 = sphi %s1799_s27, %s2115_s27   ;;  %s1737_s26 = sphi %s1797_s26, %s2114_s26   ;;  %s1733_s25 = sphi %s1795_s25, %s2113_s25   ;;  %s1729_s24 = sphi %s1793_s24, %s2112_s24  }
   0x6   : > { %s1818_s30 = sadd.s32 1, %s1741_s27   ;;  %s181_s8 = sadd.s32 1, %s1737_s26 }
   0x7   : > { %s178_s9 = ssub.s32 %s1741_s27, %s1818_s30  ;;  %p191_p0 = scmp.ne.s32.totalorder %s1737_s26, %s1733_s25 }
   0x8   : > { %p179_p1 = scmp.eq.s32.totalorder %s178_s9, 0  ;;  %p192_p2 = scmp.eq.s32.totalorder %s1814_s28, 1 }
   0x9   : > { %p197_p3 = scmp.ne.s32.totalorder %s1733_s25, %s1729_s24  ;;  %p198_p4 = scmp.eq.s32.totalorder %s1187_s29, 1 }
   0xa   : > { %s1829_s10 = scalar_select %p179_p1, %s1737_s26, %s181_s8  }
   0xb   : > { %p1831_p5 = por %p192_p2, %p191_p0  ;;  %p1835_p6 = por %p198_p4, %p197_p3 }
   0xc   : > { %p1188_p7 = scmp.ge.s32.totalorder %s1741_s27, 1  ;;  %p205_p8 = scmp.lt.s32.totalorder %s1741_s27, 3 }
   0xd   : > { %s2104_s12 = scalar_select %p1835_p6, 1, 0 }
   0xe   : > { %p2102_p9 = scmp.eq.s32.totalorder %s1814_s28, 0  ;;  %p1842_p10 = pnand %p1188_p7, %p205_p8 }
   0xf   : > { %s1743_s14 = smov [#allocation3]   ;;  %s1744_s17 = smov [#allocation6]  }
  0x10   : > { %s223_s15 = sshll.u32 %s1743_s14, 4  ;;  %p1564_p11 = pneg %p1842_p10  ;;  %s224_s15 = int_to_ptr.vmem [resolvable:$true] %s223_s15 }
  0x11   : > { %s236_s18 = sshll.u32 %s1744_s17, 4  ;;  %s1632_s19 = scalar_lea.vmem %s224_s15, 6144  ;;  %s237_s18 = int_to_ptr.vmem [resolvable:$true] %s236_s18 }
  0x12   : > { %p1850_p12 = pnand %p2102_p9, %p1564_p11  ;;  %p1633_p0 = scmp.ne.s32.totalorder %s224_s15, %s1632_s19 }
  0x13   : > { %p1640_p3 = scmp.lt.s32.totalorder %s224_s15, %s224_s15  ;;  %p1641_p4 = scmp.lt.s32.totalorder %s1632_s19, %s1632_s19 }
  0x14   : > { %p1623_p13 = pneg %p1850_p12 }
  0x15   : > { %p1642_p7 = por %p1641_p4, %p1640_p3 }
  0x16   : > { %p1635_p1 = pnand %p1633_p0, %p1623_p13 }
  0x18   : > { %p1636_p2 = pneg %p1635_p1 }
  0x1a   : > { %p1643_p8 = pnand %p1642_p7, %p1636_p2 }
  0x1c   : > { %1646 = shalt.err (!%p1643_p8)
}
  0x1d   : > { %s1745_s20 = smov 128   ;;  %s1746_s21 = smov 8  }
  0x1e   : > { %1567 = dma.hbm_to_vmem [thread:$0]  (!%p1850_p12), %s2097_s3, 6144, %s224_s15, [#allocation4], %s1745_s20, %s1745_s20, %s1746_s21  }
  0x1f   : > { %s1658_s29 = scalar_lea.vmem %s237_s18, 1024  ;;  %p1666_p9 = scmp.lt.s32.totalorder %s237_s18, %s237_s18 }
  0x20   : > { %p1659_p11 = scmp.ne.s32.totalorder %s237_s18, %s1658_s29  ;;  %p1667_p6 = scmp.lt.s32.totalorder %s1658_s29, %s1658_s29 }
  0x22   : > { %p1661_p0 = pnand %p1659_p11, %p1623_p13  ;;  %p1668_p3 = por %p1667_p6, %p1666_p9 }
  0x24   : > { %p1662_p1 = pneg %p1661_p0 }
  0x26   : > { %p1669_p2 = pnand %p1668_p3, %p1662_p1 }
  0x28   : > { %1672 = shalt.err (!%p1669_p2)
}
  0x29   : > { %1570 = dma.hbm_to_vmem [thread:$0]  (!%p1850_p12), %s2098_s4, 1024, %s237_s18, [#allocation7], %s1745_s20, %s1745_s20, %s1746_s21  }
  0x2a   : > { %266 = sbr.rel (%p1842_p10) target bundleno = 864 (0x360), region = 48  ;;  %p2107_p4 = scmp.eq.s32.totalorder (!%p1842_p10), %s1814_s28, 0 }
  0x2f   : > { %1716 = dma.done.wait (%p2107_p4), [#allocation4], 6144   ;;  %p2108_p13 = pmov %p2107_p4 }
  0x30   : > { %p2109_p7 = pmov %p2107_p4 }
  0x31   : > { %1718 = vsyncadd (%p2108_p13), [#allocation4], 4294961152 }
  0x32   : > { %1720 = dma.done.wait (%p2109_p7), [#allocation7], 1024   ;;  %p2110_p6 = pmov %p2107_p4 }
  0x33   : > { %p302_p9 = scmp.lt.s32.totalorder %s1814_s28, 1  ;;  %v1204_v0 = vld [vmem:[%s2095_s1 + $0x78] sm:$0xff]  ;;  %v1203_v1 = vld [vmem:[%s2095_s1 + $0x70] sm:$0xff]  ;;  %vm328_vm0 = vcmask 523264   ;;  %v1202_v2 = vld [vmem:[%s2095_s1 + $0x68] sm:$0xff]  ;;  %v1747_v58 = vmov 0.0  }
  0x34   : > { %1722 = vsyncadd (%p2110_p6), [#allocation7], 4294966272  ;;  %1337 = vmatprep.subr.mxu1 %v1204_v0  ;;  %v1216_v4 = vld [vmem:[%s2095_s1 + $0xb8] sm:$0xff]  ;;  %v1201_v5 = vld [vmem:[%s2095_s1 + $0x60] sm:$0xff]  ;;  %596 = vst [vmem:[#allocation2] sm:$0x1] %v1747_v58 }
  0x35   : > { %s303_s14 = scalar_select %p302_p9, %s1814_s28, 1  ;;  %1338 = vmatpush3.msra.mxu1 %v1204_v0  ;;  %1375 = vmatprep.subr.mxu0 %v1216_v4  ;;  %v1215_v6 = vld [vmem:[%s2095_s1 + $0xb0] sm:$0xff]  ;;  %v1214_v7 = vld [vmem:[%s2095_s1 + $0xa8] sm:$0xff]  ;;  %v1200_v8 = vld [vmem:[%s2095_s1 + $0x58] sm:$0xff]  ;;  %597 = vst [vmem:[#allocation2 + $0x11] sm:$0x1] %v1747_v58 }
  0x36   : > { %1339 = vmatprep.subr.mxu1 %v1203_v1  ;;  %1376 = vmatpush3.msra.mxu0 %v1216_v4  ;;  %v1213_v9 = vld [vmem:[%s2095_s1 + $0xa0] sm:$0xff]  ;;  %v1199_v10 = vld [vmem:[%s2095_s1 + $0x50] sm:$0xff]  ;;  %v1212_v11 = vld [vmem:[%s2095_s1 + $0x98] sm:$0xff]  ;;  %vm1749_vm1 = vmmov 0   ;;  %s299_s21 = sand.u32 1, %s1733_s25   ;;  %s1224_s8 = sshll.u32 %s1814_s28, 7 }
  0x37   : > { %s1553_s15 = smul.u32 24, %s303_s14  ;;  %1340 = vmatpush3.msra.mxu1 %v1203_v1  ;;  %1377 = vmatprep.subr.mxu0 %v1215_v6  ;;  %v1198_v12 = vld [vmem:[%s2095_s1 + $0x48] sm:$0xff]  ;;  %v1211_v13 = vld [vmem:[%s2095_s1 + $0x90] sm:$0xff]  ;;  %v1197_v14 = vld [vmem:[%s2095_s1 + $0x40] sm:$0xff]  ;;  %s1750_s14 = smov 120  }
  0x38   : > { %1341 = vmatprep.subr.mxu1 %v1202_v2  ;;  %1378 = vmatpush3.msra.mxu0 %v1215_v6  ;;  %v1210_v15 = vld [vmem:[%s2095_s1 + $0x88] sm:$0xff]  ;;  %v316_v17 = vld [vmem:[%s2095_s1 + $0x38] sm:$0xff]  ;;  %v315_v18 = vld [vmem:[%s2095_s1 + $0x30] sm:$0xff]  ;;  %s1195_s22 = sshll.u32 %s299_s21, 3  ;;  %s1104_s13 = scalar_lea.hbm %s2101_s7, %s1224_s8 }
  0x39   : > { %s1887_s17 = scalar_lea.vmem %s2094_s0, %s1553_s15  ;;  %1342 = vmatpush3.msra.mxu1 %v1202_v2  ;;  %1379 = vmatprep.subr.mxu0 %v1214_v7  ;;  %v1209_v19 = vld [vmem:[%s2095_s1 + $0x80] sm:$0xff]  ;;  %v314_v21 = vld [vmem:[%s2095_s1 + $0x28] sm:$0xff]  ;;  %v312_v25 = vld [vmem:[%s2095_s1 + $0x18] sm:$0xff]  ;;  %s1751_s15 = smov 8  }
  0x3a   : > { %v317_v3 = vld [vmem:[%s1887_s17 + $0x1] sm:$0xff]  ;;  %1343 = vmatprep.subr.mxu1 %v1201_v5  ;;  %1380 = vmatpush3.msra.mxu0 %v1214_v7  ;;  %v318_v16 = vld [vmem:[%s1887_s17 + $0x9] sm:$0xff]  ;;  %v633_v33 = vld [vmem:[#allocation3 + $0xe0] sm:$0xff]  ;;  %s301_s9 = scalar_lea.vmem [#allocation8], %s1195_s22  ;;  %s1093_s18 = scalar_lea.sflag [#allocation5], %s299_s21 }
  0x3b   : > { %1353 = vmatprep.mubr.msk.f32.mxu1 %vm328_vm0, %v317_v3  ;;  %1344 = vmatpush3.msra.mxu1 %v1201_v5  ;;  %v307_v20 = vld [vmem:[%s1887_s17] sm:$0xff]  ;;  %v492_v24 = vld [vmem:[%s1887_s17 + $0xa] sm:$0xff]  ;;  %v614_v40 = vld [vmem:[#allocation3 + $0x60] sm:$0xff] }
  0x3c   : > { %1345 = vmatprep.subr.mxu1 %v1200_v8  ;;  %1381 = vmatprep.subr.mxu0 %v1213_v9  ;;  %v491_v22 = vld [vmem:[%s1887_s17 + $0x2] sm:$0xff]  ;;  %v311_v26 = vld [vmem:[%s2095_s1 + $0x10] sm:$0xff]  ;;  %v629_v42 = vld [vmem:[#allocation3 + $0xc0] sm:$0xff] }
  0x3d   : > { %1346 = vmatpush3.msra.mxu1 %v1200_v8  ;;  %1382 = vmatpush3.msra.mxu0 %v1213_v9  ;;  %v313_v23 = vld [vmem:[%s2095_s1 + $0x20] sm:$0xff]  ;;  %v310_v27 = vld [vmem:[%s2095_s1 + $0x8] sm:$0xff]  ;;  %v636_v30 = vld [vmem:[#allocation3 + $0xf8] sm:$0xff] }
  0x3e   : > { %1347 = vmatprep.subr.mxu1 %v1199_v10  ;;  %1383 = vmatprep.subr.mxu0 %v1212_v11  ;;  %v309_v28 = vld [vmem:[%s2095_s1] sm:$0xff]  ;;  %v308_v29 = vld [vmem:[%s1887_s17 + $0x8] sm:$0xff]  ;;  %v617_v34 = vld [vmem:[#allocation3 + $0x78] sm:$0xff] }
  0x3f   : > { %1348 = vmatpush3.msra.mxu1 %v1199_v10  ;;  %1384 = vmatpush3.msra.mxu0 %v1212_v11  ;;  %v635_v31 = vld [vmem:[#allocation3 + $0xf0] sm:$0xff]  ;;  %v634_v32 = vld [vmem:[#allocation3 + $0xe8] sm:$0xff]  ;;  %v632_v36 = vld [vmem:[#allocation3 + $0xd8] sm:$0xff] }
  0x40   : > { %1349 = vmatprep.subr.mxu1 %v1198_v12  ;;  %1385 = vmatprep.subr.mxu0 %v1211_v13  ;;  %v616_v35 = vld [vmem:[#allocation3 + $0x70] sm:$0xff]  ;;  %v615_v37 = vld [vmem:[#allocation3 + $0x68] sm:$0xff]  ;;  %v613_v41 = vld [vmem:[#allocation3 + $0x58] sm:$0xff] }
  0x41   : > { %1350 = vmatpush3.msra.mxu1 %v1198_v12  ;;  %1386 = vmatpush3.msra.mxu0 %v1211_v13  ;;  %v631_v38 = vld [vmem:[#allocation3 + $0xd0] sm:$0xff]  ;;  %v630_v39 = vld [vmem:[#allocation3 + $0xc8] sm:$0xff]  ;;  %v628_v44 = vld [vmem:[#allocation3 + $0xb8] sm:$0xff] }
  0x42   : > { %1351 = vmatprep.subr.mxu1 %v1197_v14  ;;  %1387 = vmatprep.subr.mxu0 %v1210_v15  ;;  %v612_v43 = vld [vmem:[#allocation3 + $0x50] sm:$0xff]  ;;  %v626_v46 = vld [vmem:[#allocation3 + $0xa8] sm:$0xff]  ;;  %v625_v48 = vld [vmem:[#allocation3 + $0xa0] sm:$0xff] }
  0x43   : > { %1352 = vmatpush3.msra.mxu1 %v1197_v14  ;;  %1388 = vmatpush3.msra.mxu0 %v1210_v15  ;;  %v627_v45 = vld [vmem:[#allocation3 + $0xb0] sm:$0xff]  ;;  %v611_v47 = vld [vmem:[#allocation3 + $0x48] sm:$0xff]  ;;  %v610_v49 = vld [vmem:[#allocation3 + $0x40] sm:$0xff] }
  0x44   : > { %1354 = vmatmul.mubr.msk.f32.vlgmr.msra.gmra.mxu1 %vm328_vm0, %v318_v16  ;;  %1356 = vmatprep.subr.mxu1 %v316_v17  ;;  %v624_v50 = vld [vmem:[#allocation3 + $0x98] sm:$0xff]  ;;  %v623_v52 = vld [vmem:[#allocation3 + $0x90] sm:$0xff]  ;;  %v622_v54 = vld [vmem:[#allocation3 + $0x88] sm:$0xff] }
  0x45   : > { %1357 = vmatpush3.msra.mxu1 %v316_v17  ;;  %1389 = vmatprep.subr.mxu0 %v1209_v19  ;;  %v609_v51 = vld [vmem:[#allocation3 + $0x38] sm:$0xff]  ;;  %v608_v53 = vld [vmem:[#allocation3 + $0x30] sm:$0xff]  ;;  %v607_v55 = vld [vmem:[#allocation3 + $0x28] sm:$0xff] }
  0x46   : > { %1358 = vmatprep.subr.mxu1 %v315_v18  ;;  %1372 = vmatprep.mubr.msk.f32.mxu1 %vm328_vm0, %v307_v20  ;;  %v621_v56 = vld [vmem:[#allocation3 + $0x80] sm:$0xff]  ;;  %v805_v59 = vld [vmem:[#allocation3 + $0x178] sm:$0xff]  ;;  %v604_v61 = vld [vmem:[#allocation3 + $0x10] sm:$0xff]  ;;  %v1748_v20 = vmov -1e+30  }
  0x47   : > { %1359 = vmatpush3.msra.mxu1 %v315_v18  ;;  %1390 = vmatpush3.msra.mxu0 %v1209_v19  ;;  %v606_v57 = vld [vmem:[#allocation3 + $0x20] sm:$0xff]  ;;  %v605_v60 = vld [vmem:[#allocation3 + $0x18] sm:$0xff]  ;;  %v603_v62 = vld [vmem:[#allocation3 + $0x8] sm:$0xff] }
  0x48   : > { %1360 = vmatprep.subr.mxu1 %v314_v21  ;;  %1391 = vmatprep.mubr.msk.f32.mxu0 %vm328_vm0, %v491_v22  ;;  %v602_v63 = vld [vmem:[#allocation3] sm:$0xff]  ;;  %v1219_v5 = vld [vmem:[%s2096_s2] ss:$0 sm:$0xff]  ;;  %v804_v15 = vld [vmem:[#allocation3 + $0x170] sm:$0xff] }
  0x49   : > { %1361 = vmatpush3.msra.mxu1 %v314_v21  ;;  %1392 = vmatmul.mubr.msk.f32.vlgmr.msra.gmra.mxu0 %vm328_vm0, %v492_v24  ;;  %v803_v16 = vld [vmem:[#allocation3 + $0x168] sm:$0xff]  ;;  %v802_v17 = vld [vmem:[#allocation3 + $0x160] sm:$0xff]  ;;  %v801_v19 = vld [vmem:[#allocation3 + $0x158] sm:$0xff] }
  0x4a   : > { %1362 = vmatprep.subr.mxu1 %v313_v23  ;;  %1429 = vmatprep.subr.mxu0 %v617_v34  ;;  %v800_v24 = vld [vmem:[#allocation3 + $0x150] sm:$0xff] }
  0x4b   : > { %1363 = vmatpush3.msra.mxu1 %v313_v23  ;;  %1430 = vmatpush3.msra.mxu0 %v617_v34  ;;  %v790_v34 = vld [vmem:[#allocation3 + $0x100] sm:$0xff] }
  0x4c   : > { %1364 = vmatprep.subr.mxu1 %v312_v25  ;;  %1431 = vmatprep.subr.mxu0 %v616_v35 }
  0x4d   : > { %1365 = vmatpush3.msra.mxu1 %v312_v25  ;;  %1432 = vmatpush3.msra.mxu0 %v616_v35  ;;  %v799_v25 = vld [vmem:[#allocation3 + $0x148] sm:$0xff]  ;;  %v939_v35 = vld [vmem:[#allocation6 + $0x38] sm:$0xff] }
  0x4e   : > { %1366 = vmatprep.subr.mxu1 %v311_v26  ;;  %1433 = vmatprep.subr.mxu0 %v615_v37 }
  0x4f   : > { %1367 = vmatpush3.msra.mxu1 %v311_v26  ;;  %1434 = vmatpush3.msra.mxu0 %v615_v37  ;;  %v798_v26 = vld [vmem:[#allocation3 + $0x140] sm:$0xff]  ;;  %v937_v37 = vld [vmem:[#allocation6 + $0x28] sm:$0xff] }
  0x50   : > { %1368 = vmatprep.subr.mxu1 %v310_v27  ;;  %1435 = vmatprep.subr.mxu0 %v614_v40 }
  0x51   : > { %1369 = vmatpush3.msra.mxu1 %v310_v27  ;;  %1436 = vmatpush3.msra.mxu0 %v614_v40  ;;  %v797_v27 = vld [vmem:[#allocation3 + $0x138] sm:$0xff]  ;;  %v934_v40 = vld [vmem:[#allocation6 + $0x10] sm:$0xff] }
  0x52   : > { %1370 = vmatprep.subr.mxu1 %v309_v28  ;;  %1437 = vmatprep.subr.mxu0 %v613_v41 }
  0x53   : > { %1371 = vmatpush3.msra.mxu1 %v309_v28  ;;  %1438 = vmatpush3.msra.mxu0 %v613_v41  ;;  %v796_v28 = vld [vmem:[#allocation3 + $0x130] sm:$0xff]  ;;  %v933_v41 = vld [vmem:[#allocation6 + $0x8] sm:$0xff] }
  0x54   : > { %1373 = vmatmul.mubr.msk.f32.vlgmr.msra.gmra.mxu1 %vm328_vm0, %v308_v29  ;;  %1394 = vmatprep.subr.mxu1 %v636_v30  ;;  %v795_v29 = vld [vmem:[#allocation3 + $0x128] sm:$0xff] }
  0x55   : > { %1395 = vmatpush3.msra.mxu1 %v636_v30  ;;  %1439 = vmatprep.subr.mxu0 %v612_v43  ;;  %v794_v30 = vld [vmem:[#allocation3 + $0x120] sm:$0xff] }
  0x56   : > { %1396 = vmatprep.subr.mxu1 %v635_v31  ;;  %1440 = vmatpush3.msra.mxu0 %v612_v43  ;;  %v1220_v43 = vld [vmem:[%s1887_s17 + $0x1] ss:$2 sm:$0xff]  ;;  %s1752_s17 = smov [#allocation8]  }
  0x57   : > { %1397 = vmatpush3.msra.mxu1 %v635_v31  ;;  %1441 = vmatprep.subr.mxu0 %v611_v47  ;;  %v793_v31 = vld [vmem:[#allocation3 + $0x118] sm:$0xff]  ;;  %s1677_s28 = sshll.u32 %s1752_s17, 4  ;;  %s1678_s28 = int_to_ptr.vmem [resolvable:$false] %s1677_s28 }
  0x58   : > { %1398 = vmatprep.subr.mxu1 %v634_v32  ;;  %1442 = vmatpush3.msra.mxu0 %v611_v47  ;;  %v926_v47 = vld [vmem:[%s2099_s5 + $0x60] sm:$0xff]  ;;  %s1679_s20 = scalar_lea.vmem %s1678_s28, 256 }
  0x59   : > { %1399 = vmatpush3.msra.mxu1 %v634_v32  ;;  %1443 = vmatprep.subr.mxu0 %v610_v49  ;;  %v792_v32 = vld [vmem:[#allocation3 + $0x110] sm:$0xff] }
  0x5a   : > { %1400 = vmatprep.subr.mxu1 %v633_v33  ;;  %1444 = vmatpush3.msra.mxu0 %v610_v49  ;;  %v924_v49 = vld [vmem:[%s2099_s5 + $0x50] sm:$0xff] }
  0x5b   : > { %1401 = vmatpush3.msra.mxu1 %v633_v33  ;;  %1445 = vmatprep.subr.mxu0 %v609_v51  ;;  %v791_v33 = vld [vmem:[#allocation3 + $0x108] sm:$0xff] }
  0x5c   : > { %1402 = vmatprep.subr.mxu1 %v632_v36  ;;  %1446 = vmatpush3.msra.mxu0 %v609_v51 }
  0x5d   : > { %1403 = vmatpush3.msra.mxu1 %v632_v36  ;;  %1447 = vmatprep.subr.mxu0 %v608_v53  ;;  %v938_v36 = vld [vmem:[#allocation6 + $0x30] sm:$0xff] }
  0x5e   : > { %1404 = vmatprep.subr.mxu1 %v631_v38  ;;  %1448 = vmatpush3.msra.mxu0 %v608_v53  ;;  %v922_v53 = vld [vmem:[%s2099_s5 + $0x40] sm:$0xff] }
  0x5f   : > { %1405 = vmatpush3.msra.mxu1 %v631_v38  ;;  %1449 = vmatprep.subr.mxu0 %v607_v55  ;;  %v936_v38 = vld [vmem:[#allocation6 + $0x20] sm:$0xff] }
  0x60   : > { %1406 = vmatprep.subr.mxu1 %v630_v39  ;;  %1450 = vmatpush3.msra.mxu0 %v607_v55 }
  0x61   : > { %1407 = vmatpush3.msra.mxu1 %v630_v39  ;;  %1451 = vmatprep.subr.mxu0 %v606_v57  ;;  %v935_v39 = vld [vmem:[#allocation6 + $0x18] sm:$0xff] }
  0x62   : > { %1408 = vmatprep.subr.mxu1 %v629_v42  ;;  %1452 = vmatpush3.msra.mxu0 %v606_v57  ;;  %v920_v57 = vld [vmem:[%s2099_s5 + $0x30] sm:$0xff] }
  0x63   : > { %1409 = vmatpush3.msra.mxu1 %v629_v42  ;;  %1453 = vmatprep.subr.mxu0 %v605_v60  ;;  %v932_v42 = vld [vmem:[#allocation6] sm:$0xff] }
  0x64   : > { %1410 = vmatprep.subr.mxu1 %v628_v44  ;;  %1454 = vmatpush3.msra.mxu0 %v605_v60 }
  0x65   : > { %1411 = vmatpush3.msra.mxu1 %v628_v44  ;;  %1455 = vmatprep.subr.mxu0 %v604_v61  ;;  %v929_v44 = vld [vmem:[%s2099_s5 + $0x78] sm:$0xff] }
  0x66   : > { %1412 = vmatprep.subr.mxu1 %v627_v45  ;;  %1456 = vmatpush3.msra.mxu0 %v604_v61  ;;  %v919_v61 = vld [vmem:[%s2099_s5 + $0x28] sm:$0xff] }
  0x67   : > { %1413 = vmatpush3.msra.mxu1 %v627_v45  ;;  %1457 = vmatprep.subr.mxu0 %v603_v62  ;;  %v928_v45 = vld [vmem:[%s2099_s5 + $0x70] sm:$0xff] }
  0x68   : > { %1414 = vmatprep.subr.mxu1 %v626_v46  ;;  %1458 = vmatpush3.msra.mxu0 %v603_v62  ;;  %v918_v62 = vld [vmem:[%s2099_s5 + $0x20] sm:$0xff] }
  0x69   : > { %1415 = vmatpush3.msra.mxu1 %v626_v46  ;;  %1459 = vmatprep.subr.mxu0 %v602_v63  ;;  %v927_v46 = vld [vmem:[%s2099_s5 + $0x68] sm:$0xff] }
  0x6a   : > { %1416 = vmatprep.subr.mxu1 %v625_v48  ;;  %1460 = vmatpush3.msra.mxu0 %v602_v63 }
  0x6b   : > { %1417 = vmatpush3.msra.mxu1 %v625_v48  ;;  %1499 = vmatprep.subr.mxu0 %v1747_v58  ;;  %v925_v48 = vld [vmem:[%s2099_s5 + $0x58] sm:$0xff] }
  0x6c   : > { %1418 = vmatprep.subr.mxu1 %v624_v50 }
  0x6d   : > { %1419 = vmatpush3.msra.mxu1 %v624_v50  ;;  %v923_v50 = vld [vmem:[%s2099_s5 + $0x48] sm:$0xff] }
  0x6e   : > { %1420 = vmatprep.subr.mxu1 %v623_v52 }
  0x6f   : > { %1421 = vmatpush3.msra.mxu1 %v623_v52 }
  0x70   : > { %1422 = vmatprep.subr.mxu1 %v622_v54 }
  0x71   : > { %1423 = vmatpush3.msra.mxu1 %v622_v54  ;;  %v921_v54 = vld [vmem:[%s2099_s5 + $0x38] sm:$0xff] }
  0x72   : > { %1424 = vmatprep.subr.mxu1 %v621_v56 }
  0x73   : > { %1425 = vmatpush3.msra.mxu1 %v621_v56 }
  0x74   : > { %1464 = vmatprep.subr.mxu1 %v805_v59 }
 0x104   : > { %v1355_v0 = vpop.f32.mrf.mxu1 }
 0x106   : > { %v401_v1 = vpop.f32.mrf.mxu1 }
 0x109   : > { %v1393_v3 = vpop.f32.mrf.mxu0 }
 0x10b   : > { %v574_v9 = vpop.f32.mrf.mxu0 }
 0x114   : > { %v1374_v2 = vpop.f32.mrf.mxu1 }
 0x115   : > { %v488_v4 = vadd.f32 %v1374_v2, %v1355_v0 }
 0x116   : > { %v482_v6 = vpop.f32.mrf.mxu1 }
 0x117   : > { %v584_v7 = vadd.f32 %v1393_v3, %v488_v4  ;;  %v483_v8 = vadd.f32 %v482_v6, %v401_v1  ;;  %v917_v1 = vld [vmem:[%s2099_s5 + $0x18] sm:$0xff]  ;;  %v916_v4 = vld [vmem:[%s2099_s5 + $0x10] sm:$0xff]  ;;  %v914_v6 = vld [vmem:[%s2099_s5] sm:$0xff] }
 0x119   : > { %v593_v10 = vadd.f32 %v1219_v5, %v584_v7  ;;  %v583_v11 = vadd.f32 %v574_v9, %v483_v8  ;;  %v883_v9 = vlaneseq }
 0x11b   : > { %v595_v12 = vmax.f32 %v593_v10, 0.0  ;;  %v592_v13 = vadd.f32 %v1219_v5, %v583_v11  ;;  %v915_v5 = vld [vmem:[%s2099_s5 + $0x8] sm:$0xff]  ;;  %v884_v10 = vand.u32 127, %v883_v9 }
 0x11d   : > { %599 = vst [vmem:[#allocation2 + $0x9] sm:$0xff] %v595_v12  ;;  %v594_v14 = vmax.f32 %v592_v13, 0.0  ;;  %vm892_vm2 = vcmp.ge.s32.totalorder %v884_v10, 120  ;;  %vm885_vm3 = vcmp.lt.s32.totalorder %v884_v10, 8 }
 0x11f   : > { %598 = vst [vmem:[#allocation2 + $0x1] sm:$0xff] %v594_v14  ;;  %1426 = vmatprep.mubr.f32.mxu1 %v594_v14 }
 0x120   : > { %1427 = vmatmul.mubr.f32.vlgmr.msra.gmra.mxu1 %v595_v12 }
 0x121   : > { %1465 = vmatpush3.msra.mxu1 %v805_v59 }
 0x122   : > { %1466 = vmatprep.subr.mxu1 %v804_v15 }
 0x123   : > { %1467 = vmatpush3.msra.mxu1 %v804_v15 }
 0x124   : > { %1468 = vmatprep.subr.mxu1 %v803_v16  ;;  %v788_v18 = vld [vmem:[#allocation2 + $0xa] sm:$0xff] }
 0x125   : > { %1469 = vmatpush3.msra.mxu1 %v803_v16  ;;  %904 = vst [vmem:[#allocation2 + $0x11] sm:$0x1] %v1748_v20 }
 0x126   : > { %v600_v21 = vld [vmem:[#allocation2] sm:$0xff]  ;;  %v601_v22 = vld [vmem:[#allocation2 + $0x8] sm:$0xff]  ;;  %1470 = vmatprep.subr.mxu1 %v802_v17 }
 0x127   : > { %v787_v23 = vld [vmem:[#allocation2 + $0x2] sm:$0xff]  ;;  %1461 = vmatprep.mubr.f32.mxu0 %v600_v21  ;;  %903 = vst [vmem:[#allocation2] sm:$0x1] %v1748_v20  ;;  %1471 = vmatpush3.msra.mxu1 %v802_v17 }
 0x128   : > { %1496 = vmatprep.mubr.f32.mxu1 %v787_v23  ;;  %1462 = vmatmul.mubr.f32.vlgmr.msra.gmra.mxu0 %v601_v22 }
 0x129   : > { %1472 = vmatprep.subr.mxu1 %v801_v19  ;;  %1500 = vmatpush3.msra.mxu0 %v939_v35 }
 0x12a   : > { %1473 = vmatpush3.msra.mxu1 %v801_v19  ;;  %1515 = vmatprep.mubr.msk.f32.mxu0 %vm1749_vm1, %v1747_v58 }
 0x12b   : > { %1474 = vmatprep.subr.mxu1 %v800_v24  ;;  %1501 = vmatprep.subr.mxu0 %v1747_v58 }
 0x12c   : > { %1475 = vmatpush3.msra.mxu1 %v800_v24  ;;  %1502 = vmatpush3.msra.mxu0 %v938_v36 }
 0x12d   : > { %1476 = vmatprep.subr.mxu1 %v799_v25  ;;  %1503 = vmatprep.subr.mxu0 %v1747_v58 }
 0x12e   : > { %1477 = vmatpush3.msra.mxu1 %v799_v25  ;;  %1504 = vmatpush3.msra.mxu0 %v937_v37 }
 0x12f   : > { %1478 = vmatprep.subr.mxu1 %v798_v26  ;;  %1505 = vmatprep.subr.mxu0 %v1747_v58 }
 0x130   : > { %1479 = vmatpush3.msra.mxu1 %v798_v26  ;;  %1506 = vmatpush3.msra.mxu0 %v936_v38 }
 0x131   : > { %1480 = vmatprep.subr.mxu1 %v797_v27  ;;  %1507 = vmatprep.subr.mxu0 %v1747_v58 }
 0x132   : > { %1481 = vmatpush3.msra.mxu1 %v797_v27  ;;  %1508 = vmatpush3.msra.mxu0 %v935_v39 }
 0x133   : > { %1482 = vmatprep.subr.mxu1 %v796_v28  ;;  %1509 = vmatprep.subr.mxu0 %v1747_v58 }
 0x134   : > { %1483 = vmatpush3.msra.mxu1 %v796_v28  ;;  %1510 = vmatpush3.msra.mxu0 %v934_v40  ;;  %v1222_v28 = vld [vmem:[%s2100_s6] ss:$0 sm:$0xff] }
 0x135   : > { %1484 = vmatprep.subr.mxu1 %v795_v29  ;;  %1511 = vmatprep.subr.mxu0 %v1747_v58 }
 0x136   : > { %1485 = vmatpush3.msra.mxu1 %v795_v29  ;;  %1512 = vmatpush3.msra.mxu0 %v933_v41 }
 0x137   : > { %1486 = vmatprep.subr.mxu1 %v794_v30  ;;  %1513 = vmatprep.subr.mxu0 %v1747_v58 }
 0x138   : > { %1487 = vmatpush3.msra.mxu1 %v794_v30  ;;  %1514 = vmatpush3.msra.mxu0 %v932_v42 }
 0x139   : > { %1488 = vmatprep.subr.mxu1 %v793_v31  ;;  %1516 = vmatmul.mubr.msk.f32.vlgmr.msra.gmra.mxu0 %vm328_vm0, %v1220_v43 }
 0x13a   : > { %1489 = vmatpush3.msra.mxu1 %v793_v31  ;;  %1518 = vmatprep.subr.mxu0 %v1747_v58 }
 0x13b   : > { %1490 = vmatprep.subr.mxu1 %v792_v32  ;;  %1519 = vmatpush3.msra.mxu0 %v929_v44 }
 0x13c   : > { %1491 = vmatpush3.msra.mxu1 %v792_v32  ;;  %1550 = vmatprep.mubr.msk.f32.mxu0 %vm1749_vm1, %v1747_v58 }
 0x13d   : > { %1492 = vmatprep.subr.mxu1 %v791_v33  ;;  %1520 = vmatprep.subr.mxu0 %v1747_v58 }
 0x13e   : > { %1493 = vmatpush3.msra.mxu1 %v791_v33  ;;  %1521 = vmatpush3.msra.mxu0 %v928_v45 }
 0x13f   : > { %1494 = vmatprep.subr.mxu1 %v790_v34  ;;  %1522 = vmatprep.subr.mxu0 %v1747_v58 }
 0x140   : > { %1495 = vmatpush3.msra.mxu1 %v790_v34  ;;  %1523 = vmatpush3.msra.mxu0 %v927_v46 }
 0x141   : > { %1497 = vmatmul.mubr.f32.vlgmr.msra.gmra.mxu1 %v788_v18  ;;  %1524 = vmatprep.subr.mxu0 %v1747_v58 }
 0x142   : > { %1525 = vmatpush3.msra.mxu0 %v926_v47 }
 0x143   : > { %1526 = vmatprep.subr.mxu0 %v1747_v58 }
 0x144   : > { %1527 = vmatpush3.msra.mxu0 %v925_v48 }
 0x145   : > { %1528 = vmatprep.subr.mxu0 %v1747_v58 }
 0x146   : > { %1529 = vmatpush3.msra.mxu0 %v924_v49 }
 0x147   : > { %1530 = vmatprep.subr.mxu0 %v1747_v58 }
 0x148   : > { %1531 = vmatpush3.msra.mxu0 %v923_v50 }
 0x149   : > { %1532 = vmatprep.subr.mxu0 %v1747_v58 }
 0x14a   : > { %1533 = vmatpush3.msra.mxu0 %v922_v53 }
 0x14b   : > { %1534 = vmatprep.subr.mxu0 %v1747_v58 }
 0x14c   : > { %1535 = vmatpush3.msra.mxu0 %v921_v54 }
 0x14d   : > { %1536 = vmatprep.subr.mxu0 %v1747_v58 }
 0x14e   : > { %1537 = vmatpush3.msra.mxu0 %v920_v57 }
 0x14f   : > { %1538 = vmatprep.subr.mxu0 %v1747_v58 }
 0x150   : > { %1539 = vmatpush3.msra.mxu0 %v919_v61 }
 0x151   : > { %1540 = vmatprep.subr.mxu0 %v1747_v58 }
 0x152   : > { %1541 = vmatpush3.msra.mxu0 %v918_v62 }
 0x153   : > { %1542 = vmatprep.subr.mxu0 %v1747_v58 }
 0x154   : > { %1543 = vmatpush3.msra.mxu0 %v917_v1 }
 0x155   : > { %1544 = vmatprep.subr.mxu0 %v1747_v58 }
 0x156   : > { %1545 = vmatpush3.msra.mxu0 %v916_v4 }
 0x157   : > { %1546 = vmatprep.subr.mxu0 %v1747_v58 }
 0x158   : > { %1547 = vmatpush3.msra.mxu0 %v915_v5 }
 0x159   : > { %1548 = vmatprep.subr.mxu0 %v1747_v58 }
 0x15a   : > { %1549 = vmatpush3.msra.mxu0 %v914_v6 }
 0x1e0   : > { %v1428_v51 = vpop.f32.mrf.mxu1 }
 0x1e2   : > { %v703_v55 = vpop.f32.mrf.mxu1 }
 0x1e8   : > { %v1463_v52 = vpop.f32.mrf.mxu0 }
 0x1e9   : > { %v784_v2 = vadd.f32 %v1463_v52, %v1428_v51 }
 0x1ea   : > { %v778_v56 = vpop.f32.mrf.mxu0 }
 0x1eb   : > { %v779_v60 = vadd.f32 %v778_v56, %v703_v55 }
 0x1f9   : > { %v1009_v7 = vpop.f32.mrf.mxu0 }
 0x1fb   : > { %v1517_v8 = vpop.f32.mrf.mxu0 }
 0x201   : > { %v1498_v59 = vpop.f32.mrf.mxu1 }
 0x202   : > { %v882_v3 = vadd.f32 %v1498_v59, %v784_v2 }
 0x203   : > { %v872_v63 = vpop.f32.mrf.mxu1 }
 0x204   : > { %v881_v0 = vadd.f32 %v872_v63, %v779_v60 }
 0x206   : > { %893 = vrot.lane.b32.xlu1 %v881_v0, %s1750_s14  ;;  %886 = vrot.lane.b32.xlu0 %v881_v0, %s1751_s15 }
 0x20a   : > { %895 = vrot.lane.b32.xlu1 %v882_v3, %s1750_s14  ;;  %888 = vrot.lane.b32.xlu0 %v882_v3, %s1751_s15  ;;  %s1106_s14 = sshll.u32 %s301_s9, 4  ;;  %s1107_s14 = int_to_ptr.vmem [resolvable:$true] %s1106_s14 }
 0x20b   : > { %s1673_s19 = scalar_lea.vmem %s1107_s14, 128  ;;  %p1680_p11 = scmp.lt.s32.totalorder %s1107_s14, %s1678_s28 }
 0x20c   : > { %p1674_p10 = scmp.ne.s32.totalorder %s1107_s14, %s1673_s19  ;;  %p1681_p0 = scmp.lt.s32.totalorder %s1679_s20, %s1673_s19 }
 0x20e   : > { %p1675_p12 = pnand %p1674_p10, %p1831_p5  ;;  %p1682_p1 = por %p1681_p0, %p1680_p11 }
 0x210   : > { %p1676_p8 = pneg %p1675_p12 }
 0x212   : > { %p1683_p3 = pnand %p1682_p1, %p1676_p8 }
 0x278   : > { %v894_v11 = vpop.permute.xlu1 %893  ;;  %v887_v12 = vpop.permute.xlu0 %886 }
 0x279   : > { %v897_v13 = vsel %vm892_vm2, -1e+30, %v894_v11  ;;  %v890_v14 = vsel %vm885_vm3, -1e+30, %v887_v12 }
 0x27a   : > { %v899_v15 = vmax.f32 %v890_v14, %v897_v13 }
 0x27c   : > { %v901_v16 = vmax.f32 %v881_v0, %v899_v15  ;;  %v896_v17 = vpop.permute.xlu1 %895  ;;  %v889_v18 = vpop.permute.xlu0 %888 }
 0x27d   : > { %v898_v19 = vsel %vm892_vm2, -1e+30, %v896_v17  ;;  %v891_v20 = vsel %vm885_vm3, -1e+30, %v889_v18 }
 0x27e   : > { %905 = vst [vmem:[#allocation2 + $0x1] sm:$0xff] %v901_v16  ;;  %v900_v58 = vmax.f32 %v891_v20, %v898_v19 }
 0x280   : > { %v902_v21 = vmax.f32 %v882_v3, %v900_v58 }
 0x282   : > { %906 = vst [vmem:[#allocation2 + $0x9] sm:$0xff] %v902_v21 }
 0x289   : > { %v907_v22 = vld [vmem:[#allocation2] ss:$2 sm:$0xff]  ;;  %v909_v23 = vld [vmem:[#allocation2 + $0x1] ss:$2 sm:$0xff] }
 0x28a   : > { %v910_v24 = vmax.f32 %v907_v22, %v909_v23  ;;  %v912_v25 = vld [vmem:[#allocation2 + $0x2] ss:$2 sm:$0xff] }
 0x28c   : > { %v913_v26 = vmax.f32 %v910_v24, %v912_v25 }
 0x28e   : > { %1551 = vmatmul.mubr.f32.vlgmr.msra.gmra.mxu0 %v913_v26 }
 0x34e   : > { %v1079_v27 = vpop.f32.mrf.mxu0 }
 0x34f   : > { %v1080_v29 = vadd.f32 %v1079_v27, %v1009_v7 }
 0x350   : > { %v1552_v30 = vpop.f32.mrf.mxu0 }
 0x351   : > { %v1090_v31 = vadd.f32 %v1222_v28, %v1080_v29 }
 0x353   : > { %1091 = vst.msk [vmem:[%s301_s9] sm:$0xff] %vm328_vm0, %v1090_v31 }
 0x354   : > { %1686 = shalt.err (!%p1683_p3)
}
 0x355   : > { %s1687_s22 = scalar_lea.hbm %s1104_s13, 128  ;;  %s1691_s29 = scalar_lea.hbm %s2101_s7, 256 }
 0x356   : > { %p1688_p2 = scmp.ne.s32.totalorder %s1104_s13, %s1687_s22  ;;  %p1692_p7 = scmp.lt.s32.totalorder %s1104_s13, %s2101_s7 }
 0x357   : > { %p1693_p6 = scmp.lt.s32.totalorder %s1691_s29, %s1687_s22 }
 0x358   : > { %p1689_p4 = pnand %p1688_p2, %p1831_p5 }
 0x359   : > { %p1694_p9 = por %p1693_p6, %p1692_p7 }
 0x35a   : > { %p1690_p13 = pneg %p1689_p4 }
 0x35c   : > { %p1695_p10 = pnand %p1694_p9, %p1690_p13 }
 0x35e   : > { %1698 = shalt.err (!%p1695_p10)
}
 0x35f   : > { %1562 = dma.vmem_to_hbm [thread:$0]  (%p1831_p5), %s1107_s14, 128, %s1104_s13, %s1093_s18  }
 0x360 PF: > { %p1579_p12 = scmp.ge.s32.totalorder %s1741_s27, 2  ;;  %s1118_s15 = sand.u32 1, %s1729_s24  }
 0x361   : > { %p2111_p8 = scmp.ne.s32.totalorder %s2104_s12, 0  ;;  %s1119_s16 = scalar_lea.sflag [#allocation5], %s1118_s15 }
 0x363   : > { %p1572_p11 = pnand %p1579_p12, %p2111_p8 }
 0x365   : > { %p1573_p0 = pneg %p1572_p11 }
 0x367   : > { %1724 = dma.done.wait (%p1573_p0), %s1119_s16, 128  }
 0x368   : > { %1726 = vsyncadd (%p1573_p0), %s1119_s16, 4294967168  ;;  %p19_p1 = scmp.ge.s32.totalorder %s1818_s30, 4   ;;  %s2112_s24 = smov %s1733_s25 }
 0x369   : > { %s2113_s25 = smov %s1737_s26  ;;  %s2114_s26 = smov %s1829_s10 }
 0x36a   : > { %s2115_s27 = smov %s1818_s30  ;;  %21 = sbr.rel (!%p19_p1) target bundleno = 5 (0x5), region = 99 }
 0x36f   :  { %1124 = vsyncpa [#allocation4], 1 }
 0x370   :  { %1126 = vsyncpa [#allocation4 + $0x1], 1 }
 0x371   :  { %1127 = vsyncpa [#allocation7], 1 }
 0x372   :  { %1128 = vsyncpa [#allocation5], 1 }
 0x373   :  { %1130 = vsyncpa [#allocation5 + $0x1], 1 }

</bundles_post_ra>
